<compile_context>
chip_gen: v7x
topology: tpu7x:2x2x1
jax: 0.10.0
libtpu: 0.0.40
codegen_flags: <defaults>
</compile_context>

<pallas_src>
import jax
import jax.numpy as jnp
from jax.experimental import pallas as pl
from jax.experimental.pallas import tpu as pltpu


def _outconv_kernel(x_ref, w_ref, b_ref, y_ref):
    # x_ref: (2*Cin, tm)     stacked [real; imag] activations, batch*spatial on lanes
    # w_ref: (2*Cout, 2*Cin) fused real-equivalent complex weight (VMEM-resident)
    # b_ref: (2*Cout, 1)     stacked [real; imag] bias (VMEM-resident)
    # y_ref: (2*Cout, tm)    stacked [real; imag] output, lane-dense
    y = jnp.dot(w_ref[...], x_ref[...], preferred_element_type=jnp.float32)
    y_ref[...] = y + b_ref[...]          # bias broadcasts over lanes


def _pick_lane_tile(L, Cin, Cout):
    """Lane tile: sized from a ~24 MiB double-buffered in+out VMEM budget and
    balanced against L so ragged padding is at most 127 lanes."""
    bytes_per_lane = (2 * Cin + 2 * Cout) * 4            # f32 in + out per lane column
    budget = 24 * 1024 * 1024                            # double-buffered in+out target
    tm_max = (budget // (2 * bytes_per_lane)) // 128 * 128
    tm_max = max(128, min(tm_max, 256 * 1024))
    if L <= tm_max:
        return L                                         # single block == full lane extent
    n_tiles = pl.cdiv(L, tm_max)
    return pl.cdiv(pl.cdiv(L, n_tiles), 128) * 128       # balanced, multiple of 128


def out_conv(x, weight, bias, *, tm=None):
    """1x1 complex Conv2d (PyTorch OutConv forward).

    x:      (N, Cin, H, W) complex64
    weight: (Cout, Cin, 1, 1) complex64
    bias:   (Cout,) complex64
    returns (N, Cout, H, W) complex64
    """
    N, Cin, H, W = x.shape
    Cout = weight.shape[0]
    HW = H * W
    L = N * HW

    if tm is None:
        tm = _pick_lane_tile(L, Cin, Cout)
    grid = (pl.cdiv(L, tm),)

    # ONE fused repack pass: complex64 NCHW -> stacked-real f32 (2*Cin, N*HW).
    # real/imag extraction + transpose + concat fuse into a single XLA copy.
    # TODO(synk): lax.bitcast_convert_type does not support complex dtypes, so a
    # zero-copy reinterpret of the complex64 buffer is unavailable; this repack
    # (and the matching unpack) is the only remaining wrapper HBM traffic.
    x3 = x.reshape(N, Cin, HW)
    xt = jnp.transpose(x3, (1, 0, 2))                            # (Cin, N, HW)
    xs = jnp.concatenate([jnp.real(xt), jnp.imag(xt)],
                         axis=0).reshape(2 * Cin, L)             # (2*Cin, L) f32

    # Real-equivalent complex weight: [[wr, -wi], [wi, wr]] -> (2*Cout, 2*Cin).
    w2d = weight.reshape(Cout, Cin)
    wr, wi = jnp.real(w2d), jnp.imag(w2d)
    w_big = jnp.concatenate(
        [jnp.concatenate([wr, -wi], axis=1),
         jnp.concatenate([wi, wr], axis=1)], axis=0)

    # Stacked bias, broadcast over lanes inside the kernel.
    b_big = jnp.concatenate([jnp.real(bias), jnp.imag(bias)]).reshape(2 * Cout, 1)

    # VMEM budget: double-buffered in+out blocks + resident weight/bias + slack,
    # clamped to [16 MiB, 48 MiB] so it is valid on v5e / v6e / v7x (64 MiB phys).
    block_bytes = (2 * Cin + 2 * Cout) * tm * 4
    vmem_limit = int(min(max(2 * block_bytes + (2 << 20), 16 * 1024 * 1024),
                         48 * 1024 * 1024))

    cost = pl.CostEstimate(
        flops=2 * (2 * Cout) * (2 * Cin) * L,
        transcendentals=0,
        bytes_accessed=(2 * Cin + 2 * Cout) * L * 4
        + (2 * Cout) * (2 * Cin) * 4 + (2 * Cout) * 4,
    )

    ys = pl.pallas_call(
        _outconv_kernel,
        out_shape=jax.ShapeDtypeStruct((2 * Cout, L), jnp.float32),
        grid=grid,
        in_specs=[
            pl.BlockSpec((2 * Cin, tm), lambda t: (0, t)),
            pl.BlockSpec((2 * Cout, 2 * Cin), lambda t: (0, 0)),   # resident
            pl.BlockSpec((2 * Cout, 1), lambda t: (0, 0)),         # resident
        ],
        out_specs=pl.BlockSpec((2 * Cout, tm), lambda t: (0, t)),
        compiler_params=pltpu.CompilerParams(
            dimension_semantics=("parallel",),
            vmem_limit_bytes=vmem_limit),
        cost_estimate=cost,
    )(xs, w_big, b_big)

    # ONE fused unpack pass: (2*Cout, N*HW) f32 -> (N, Cout, H, W) complex64.
    yr = ys[:Cout].reshape(Cout, N, HW)
    yi = ys[Cout:].reshape(Cout, N, HW)
    y = jax.lax.complex(yr, yi)
    return jnp.transpose(y, (1, 0, 2)).reshape(N, Cout, H, W)


if __name__ == "__main__":
    key = jax.random.PRNGKey(0)
    k1, k2, k3, k4, k5, k6 = jax.random.split(key, 6)

    N, Cin, Cout = 2, 4, 3

    weight = (0.1 * jax.random.normal(k3, (Cout, Cin, 1, 1), dtype=jnp.float32)
              + 1j * 0.1 * jax.random.normal(k4, (Cout, Cin, 1, 1), dtype=jnp.float32)
              ).astype(jnp.complex64)
    bias = (0.1 * jax.random.normal(k5, (Cout,), dtype=jnp.float32)
            + 1j * 0.1 * jax.random.normal(k6, (Cout,), dtype=jnp.float32)
            ).astype(jnp.complex64)
    w2d = weight.reshape(Cout, Cin)

    f_auto = jax.jit(lambda xx: out_conv(xx, weight, bias))
    f_tile = jax.jit(lambda xx: out_conv(xx, weight, bias, tm=128))  # forces ragged grid

    cases = [((16, 16), f_auto),   # divisible lane extent, single big block
             ((13, 11), f_tile)]   # ragged last lane tile, masked edge path

    for (H, W), fn in cases:
        kx, ky = jax.random.split(jax.random.fold_in(k1, H * 100 + W), 2)
        x = (jax.random.normal(kx, (N, Cin, H, W), dtype=jnp.float32)
             + 1j * jax.random.normal(ky, (N, Cin, H, W), dtype=jnp.float32)
             ).astype(jnp.complex64)

        y = jax.block_until_ready(fn(x))

        y_ref = jnp.einsum("oc,nchw->nohw", w2d, x,
                           precision=jax.lax.Precision.HIGHEST) \
            + bias[None, :, None, None]
        assert y.shape == (N, Cout, H, W)
        err = float(jnp.max(jnp.abs(y - y_ref)))
        assert err < 1e-2, f"max abs error {err} at H={H}, W={W}"

    print("KERNEL_OK")
</pallas_src>

<mosaic_0001>
module attributes {stable_mosaic.version = 11 : i64} {
  func.func @_outconv_kernel(%arg0: i32, %arg1: memref<8x512xf32, #tpu.memory_space<vmem>>, %arg2: memref<6x8xf32, #tpu.memory_space<vmem>>, %arg3: memref<6x1xf32, #tpu.memory_space<vmem>>, %arg4: memref<6x512xf32, #tpu.memory_space<vmem>>) attributes {dimension_semantics = [#tpu.dimension_semantics<parallel>], iteration_bounds = array<i64: 1>, scalar_prefetch = 0 : i64, scratch_operands = 0 : i64, tpu.core_type = #tpu.core_type<tc>, window_params = [{transform_indices = @transform_0, window_bounds = array<i64: 8, 512>}, {pipeline_mode = #tpu.pipeline_mode<synchronous>, transform_indices = @transform_1, window_bounds = array<i64: 6, 8>}, {pipeline_mode = #tpu.pipeline_mode<synchronous>, transform_indices = @transform_2, window_bounds = array<i64: 6, 1>}, {transform_indices = @transform_3, window_bounds = array<i64: 6, 512>}]} {
    %c0 = arith.constant 0 : index
    %c0_0 = arith.constant 0 : index
    %0 = vector.load %arg2[%c0, %c0_0] : memref<6x8xf32, #tpu.memory_space<vmem>>, vector<6x8xf32>
    %c0_1 = arith.constant 0 : index
    %c0_2 = arith.constant 0 : index
    %1 = vector.load %arg1[%c0_1, %c0_2] : memref<8x512xf32, #tpu.memory_space<vmem>>, vector<8x512xf32>
    %cst = arith.constant dense<0.000000e+00> : vector<6x512xf32>
    %2 = tpu.matmul %0, %1, %cst {dimension_numbers = #tpu.dot_dimension_numbers<[1], [0], [0], [1], [0, 0, 1, 1], [], []>} : vector<6x8xf32>, vector<8x512xf32>, vector<6x512xf32> -> vector<6x512xf32>
    %c0_3 = arith.constant 0 : index
    %c0_4 = arith.constant 0 : index
    %3 = vector.load %arg3[%c0_3, %c0_4] : memref<6x1xf32, #tpu.memory_space<vmem>>, vector<6x1xf32>
    %4 = vector.broadcast %3 : vector<6x1xf32> to vector<6x512xf32>
    %5 = arith.addf %2, %4 : vector<6x512xf32>
    %c0_5 = arith.constant 0 : index
    %c0_6 = arith.constant 0 : index
    %6 = vector.load %arg4[%c0_5, %c0_6] : memref<6x512xf32, #tpu.memory_space<vmem>>, vector<6x512xf32>
    tpu.vector_store %arg4[%c0_5, %c0_6], %5 {strides = array<i32>} : memref<6x512xf32, #tpu.memory_space<vmem>>, vector<6x512xf32>,
    return
  }
  func.func @transform_0(%arg0: i32) -> (i32, i32) {
    %c0_i32 = arith.constant 0 : i32
    %c0_i32_0 = arith.constant 0 : i32
    return %c0_i32, %arg0 : i32, i32
  }
  func.func @transform_1(%arg0: i32) -> (i32, i32) {
    %c0_i32 = arith.constant 0 : i32
    %c0_i32_0 = arith.constant 0 : i32
    %c0_i32_1 = arith.constant 0 : i32
    return %c0_i32, %c0_i32_0 : i32, i32
  }
  func.func @transform_2(%arg0: i32) -> (i32, i32) {
    %c0_i32 = arith.constant 0 : i32
    %c0_i32_0 = arith.constant 0 : i32
    %c0_i32_1 = arith.constant 0 : i32
    return %c0_i32, %c0_i32_0 : i32, i32
  }
  func.func @transform_3(%arg0: i32) -> (i32, i32) {
    %c0_i32 = arith.constant 0 : i32
    %c0_i32_0 = arith.constant 0 : i32
    return %c0_i32, %arg0 : i32, i32
  }
}

</mosaic_0001>

<bundles_post_ra>
// kernel: custom-call
= control target key start
LH: loop header
LB: loop body
LE: loop exit
PB: predicated region body
PF: predicated region fallthrough
CT: control target
= control target key end

     0   :  { %2 = vsyncpa [#allocation0], 0  ;;  %s61_s0 = inlined_call_operand.hbm [shape: c64[2,4,16,16], index: 0, kind: input, shape index: {}]   ;;  %s62_s1 = inlined_call_operand.vmem [shape: f32[2,4,16,16], index: 1, kind: output, shape index: {}]  }
   0x1   :  { %s3_s8 = sshll.u32 %s62_s1, 4  ;;  %s9_s11 = scalar_lea.hbm %s61_s0, 2048  ;;  %s4_s8 = int_to_ptr.vmem [resolvable:$true] %s3_s8 }
   0x2   :  { %p10_p0 = scmp.ne.s32.totalorder %s61_s0, %s9_s11  ;;  %s11_s16 = scalar_lea.hbm %s61_s0, 4096 }
   0x3   :  { %p12_p1 = scmp.lt.u32.totalorder %s11_s16, %s9_s11  ;;  %p13_p2 = scmp.lt.u32.totalorder %s9_s11, %s61_s0 }
   0x5   :  { %p14_p3 = por %p13_p2, %p12_p1 }
   0x7   :  { %p15_p4 = pnand %p14_p3, %p10_p0 }
   0x9   :  { %18 = shalt.err (!%p15_p4)  }
   0xa   :  { %s19_s1 = scalar_lea.vmem %s4_s8, 2048  ;;  %p24_p6 = scmp.lt.s32.totalorder %s4_s8, %s4_s8 }
   0xb   :  { %p20_p5 = scmp.ne.s32.totalorder %s4_s8, %s19_s1  ;;  %p25_p7 = scmp.lt.s32.totalorder %s19_s1, %s19_s1 }
   0xd   :  { %p26_p8 = por %p25_p7, %p24_p6 }
   0xf   :  { %p27_p9 = pnand %p26_p8, %p20_p5 }
  0x11   :  { %30 = shalt.err (!%p27_p9)  }
  0x12   :  { %6 = dma.hbm_to_vmem [thread:$0]  %s61_s0, 2048, %s4_s8, [#allocation0] }
  0x13   :  { %31 = dma.done.wait [#allocation0], 2048  }
  0x14   :  { %32 = vsyncadd [#allocation0], 4294965248 }
  0x15   :  { %8 = vsyncpa [#allocation0], 1 }

// kernel: custom-call.1
= control target key start
LH: loop header
LB: loop body
LE: loop exit
PB: predicated region body
PF: predicated region fallthrough
CT: control target
= control target key end

     0   :  { %s59_s0 = inlined_call_operand.hbm [shape: c64[2,4,16,16], index: 0, kind: input, shape index: {}]   ;;  %s60_s1 = inlined_call_operand.vmem [shape: f32[2,4,16,16], index: 1, kind: output, shape index: {}]  }
   0x1   :  { %s2_s8 = scalar_lea.hbm %s59_s0, 2048 }
   0x2   :  { %3 = vsyncpa [#allocation0], 0  ;;  %s4_s11 = sshll.u32 %s60_s1, 4  ;;  %s34_s14 = scalar_lea.hbm %s59_s0, 4096  ;;  %s5_s11 = int_to_ptr.vmem [resolvable:$true] %s4_s11 }
   0x3   :  { %p11_p0 = scmp.ne.s32.totalorder %s2_s8, %s34_s14  ;;  %p13_p1 = scmp.lt.u32.totalorder %s2_s8, %s59_s0 }
   0x4   :  { %p14_p2 = scmp.lt.u32.totalorder %s34_s14, %s34_s14  ;;  %p16_p4 = scmp.lt.u32.totalorder %s34_s14, %s2_s8 }
   0x6   :  { %p15_p3 = por %p14_p2, %p13_p1 }
   0x8   :  { %p17_p5 = por %p16_p4, %p15_p3 }
   0xa   :  { %p18_p6 = pnand %p17_p5, %p11_p0 }
   0xc   :  { %21 = shalt.err (!%p18_p6)  }
   0xd   :  { %s22_s17 = scalar_lea.vmem %s5_s11, 2048  ;;  %p27_p8 = scmp.lt.s32.totalorder %s5_s11, %s5_s11 }
   0xe   :  { %p23_p7 = scmp.ne.s32.totalorder %s5_s11, %s22_s17  ;;  %p28_p9 = scmp.lt.s32.totalorder %s22_s17, %s22_s17 }
  0x10   :  { %p29_p10 = por %p28_p9, %p27_p8 }
  0x12   :  { %p30_p11 = pnand %p29_p10, %p23_p7 }
  0x14   :  { %33 = shalt.err (!%p30_p11)  }
  0x15   :  { %7 = dma.hbm_to_vmem [thread:$0]  %s2_s8, 2048, %s5_s11, [#allocation0] }
  0x16   :  { %35 = dma.done.wait [#allocation0], 2048  }
  0x17   :  { %36 = vsyncadd [#allocation0], 4294965248 }
  0x18   :  { %9 = vsyncpa [#allocation0], 1 }

// kernel: custom-call.2
= control target key start
LH: loop header
LB: loop body
LE: loop exit
PB: predicated region body
PF: predicated region fallthrough
CT: control target
= control target key end

     0   :  { %s312_s0 = inlined_call_operand.vmem [shape: f32[2,3,16,16], index: 0, kind: input, shape index: {}]   ;;  %s313_s2 = inlined_call_operand.vmem [shape: c64[2,3,16,16], index: 2, kind: output, shape index: {}]   ;;  %s314_s1 = inlined_call_operand.vmem [shape: f32[2,3,16,16], index: 1, kind: input, shape index: {}]  }
   0x1   :  { %v5_v0 = vld [vmem:[%s312_s0] sm:$0xff]  ;;  %v108_v1 = vld [vmem:[%s312_s0 + $0x8] sm:$0xff]  ;;  %v110_v2 = vld [vmem:[%s312_s0 + $0x10] sm:$0xff] }
   0x2   :  { %6 = vst [vmem:[%s313_s2] sm:$0xff] %v5_v0  ;;  %109 = vst [vmem:[%s313_s2 + $0x8] sm:$0xff] %v108_v1  ;;  %v112_v3 = vld [vmem:[%s312_s0 + $0x18] sm:$0xff]  ;;  %v114_v4 = vld [vmem:[%s312_s0 + $0x20] sm:$0xff] }
   0x3   :  { %111 = vst [vmem:[%s313_s2 + $0x10] sm:$0xff] %v110_v2  ;;  %v116_v5 = vld [vmem:[%s312_s0 + $0x28] sm:$0xff]  ;;  %113 = vst [vmem:[%s313_s2 + $0x18] sm:$0xff] %v112_v3  ;;  %v118_v6 = vld [vmem:[%s312_s0 + $0x30] sm:$0xff] }
   0x4   :  { %115 = vst [vmem:[%s313_s2 + $0x20] sm:$0xff] %v114_v4  ;;  %117 = vst [vmem:[%s313_s2 + $0x28] sm:$0xff] %v116_v5  ;;  %v120_v7 = vld [vmem:[%s312_s0 + $0x38] sm:$0xff]  ;;  %v122_v8 = vld [vmem:[%s312_s0 + $0x40] sm:$0xff] }
   0x5   :  { %119 = vst [vmem:[%s313_s2 + $0x30] sm:$0xff] %v118_v6  ;;  %121 = vst [vmem:[%s313_s2 + $0x38] sm:$0xff] %v120_v7  ;;  %v124_v9 = vld [vmem:[%s312_s0 + $0x48] sm:$0xff]  ;;  %v126_v10 = vld [vmem:[%s312_s0 + $0x50] sm:$0xff] }
   0x6   :  { %123 = vst [vmem:[%s313_s2 + $0x40] sm:$0xff] %v122_v8  ;;  %v128_v11 = vld [vmem:[%s312_s0 + $0x58] sm:$0xff]  ;;  %125 = vst [vmem:[%s313_s2 + $0x48] sm:$0xff] %v124_v9  ;;  %v51_v12 = vld [vmem:[%s314_s1] sm:$0xff] }
   0x7   :  { %127 = vst [vmem:[%s313_s2 + $0x50] sm:$0xff] %v126_v10  ;;  %129 = vst [vmem:[%s313_s2 + $0x58] sm:$0xff] %v128_v11  ;;  %v131_v13 = vld [vmem:[%s314_s1 + $0x8] sm:$0xff]  ;;  %v133_v14 = vld [vmem:[%s314_s1 + $0x10] sm:$0xff] }
   0x8   :  { %130 = vst [vmem:[%s313_s2 + $0x60] sm:$0xff] %v51_v12  ;;  %132 = vst [vmem:[%s313_s2 + $0x68] sm:$0xff] %v131_v13  ;;  %v135_v15 = vld [vmem:[%s314_s1 + $0x18] sm:$0xff]  ;;  %v137_v16 = vld [vmem:[%s314_s1 + $0x20] sm:$0xff] }
   0x9   :  { %134 = vst [vmem:[%s313_s2 + $0x70] sm:$0xff] %v133_v14  ;;  %v139_v17 = vld [vmem:[%s314_s1 + $0x28] sm:$0xff]  ;;  %136 = vst [vmem:[%s313_s2 + $0x78] sm:$0xff] %v135_v15  ;;  %v141_v18 = vld [vmem:[%s314_s1 + $0x30] sm:$0xff] }
   0xa   :  { %138 = vst [vmem:[%s313_s2 + $0x80] sm:$0xff] %v137_v16  ;;  %140 = vst [vmem:[%s313_s2 + $0x88] sm:$0xff] %v139_v17  ;;  %v143_v19 = vld [vmem:[%s314_s1 + $0x38] sm:$0xff]  ;;  %v145_v20 = vld [vmem:[%s314_s1 + $0x40] sm:$0xff] }
   0xb   :  { %142 = vst [vmem:[%s313_s2 + $0x90] sm:$0xff] %v141_v18  ;;  %144 = vst [vmem:[%s313_s2 + $0x98] sm:$0xff] %v143_v19  ;;  %v147_v21 = vld [vmem:[%s314_s1 + $0x48] sm:$0xff]  ;;  %v149_v22 = vld [vmem:[%s314_s1 + $0x50] sm:$0xff] }
   0xc   :  { %146 = vst [vmem:[%s313_s2 + $0xa0] sm:$0xff] %v145_v20  ;;  %v151_v23 = vld [vmem:[%s314_s1 + $0x58] sm:$0xff]  ;;  %148 = vst [vmem:[%s313_s2 + $0xa8] sm:$0xff] %v147_v21 }
   0xd   :  { %150 = vst [vmem:[%s313_s2 + $0xb0] sm:$0xff] %v149_v22  ;;  %152 = vst [vmem:[%s313_s2 + $0xb8] sm:$0xff] %v151_v23 }

// kernel: _lambda_.1
= control target key start
LH: loop header
LB: loop body
LE: loop exit
PB: predicated region body
PF: predicated region fallthrough
CT: control target
= control target key end

     0   :  { %v184_v3 = vmov 0.0   ;;  %vm25_vm0 = vcmask 64512   ;;  %v185_v7 = vmov 0   ;;  %s236_s0 = inlined_call_operand.vmem [shape: f32[8,512], index: 0, kind: input, shape index: {}]   ;;  %s237_s1 = inlined_call_operand.vmem [shape: f32[6,8], index: 1, kind: input, shape index: {}]   ;;  %s238_s2 = inlined_call_operand.vmem [shape: f32[6,1], index: 2, kind: input, shape index: {}]   ;;  %s239_s3 = inlined_call_operand.vmem [shape: f32[6,512], index: 3, kind: output, shape index: {}]  }
   0x1   :  { %v16_v0 = vld [vmem:[%s236_s0 + $0x8] sm:$0xff]  ;;  %v18_v1 = vld [vmem:[%s236_s0 + $0x18] sm:$0xff]  ;;  %v15_v2 = vld [vmem:[%s236_s0] sm:$0xff]  ;;  %93 = vmatprep.mubr.f32.mxu0 %v184_v3  ;;  %164 = vmatprep.mubr.f32.mxu1 %v184_v3 }
   0x2   :  { %29 = vmatprep.subr.mxu0 %v16_v0  ;;  %100 = vmatprep.subr.mxu1 %v18_v1  ;;  %v17_v4 = vld [vmem:[%s236_s0 + $0x10] sm:$0xff]  ;;  %v14_v5 = vld [vmem:[%s237_s1] sm:$0x3f] }
   0x3   :  { %30 = vmatpush1.msra.mxu0 %v15_v2  ;;  %101 = vmatpush1.msra.mxu1 %v17_v4  ;;  %v19_v6 = vld [vmem:[%s238_s2] sm:$0x3f] }
   0x4   :  { %179 = vmatmul.mubr.msk.f32.vlgmr.msra.gmra.mrb[0].mxu0 %vm25_vm0, %v14_v5  ;;  %180 = vmatmul.mubr.msk.f32.vlgmr.msra.gmra.mrb[0].mxu1 %vm25_vm0, %v14_v5 }
   0x5   :  { %183 = vset.pattern.permute.xlu0 %v185_v7 }
   0x6   :  { %22 = vperm.xlu0 %183, %v19_v6  }
  0x85   :  { %v23_v8 = vpop.permute.xlu0 %22 }
  0xd7   :  { %v95_v9 = vpop.f32.mrb[0].mxu0  ;;  %v166_v10 = vpop.f32.mrb[0].mxu1 }
  0xd8   :  { %v96_v11 = vadd.f32 %v95_v9, %v23_v8  ;;  %v167_v12 = vadd.f32 %v166_v10, %v23_v8  ;;  %v97_v13 = vpop.f32.mrb[1].mxu0  ;;  %v168_v14 = vpop.f32.mrb[1].mxu1 }
  0xd9   :  { %v98_v15 = vadd.f32 %v97_v13, %v23_v8  ;;  %v169_v16 = vadd.f32 %v168_v14, %v23_v8 }
  0xda   :  { %171 = vst [vmem:[%s239_s3] sm:$0x3f] %v96_v11  ;;  %173 = vst [vmem:[%s239_s3 + $0x10] sm:$0x3f] %v167_v12 }
  0xdb   :  { %172 = vst [vmem:[%s239_s3 + $0x8] sm:$0x3f] %v98_v15  ;;  %174 = vst [vmem:[%s239_s3 + $0x18] sm:$0x3f] %v169_v16 }

</bundles_post_ra>
